<compile_context>
chip_gen: v7x
topology: tpu7x:2x2x1
jax: 0.10.0
libtpu: 0.0.40
codegen_flags: <defaults>
</compile_context>

<pallas_src>
import jax
import jax.numpy as jnp
from jax.experimental import pallas as pl
from jax.experimental.pallas import tpu as pltpu

N_CHANNELS = 3
N_CLASSES = 35  # len(classes) in the reference script


def _passthrough_kernel(x_ref, w_ref, b_ref, o_ref):
    # x_ref: (C_in, TN)   pixels on the lane axis
    # w_ref: (C_out, C_in)
    # b_ref: (C_out, 1)
    # o_ref: (C_out, TN)
    #
    # 1x1 conv == channel contraction; push K=3 onto the idle MXU instead of the
    # VALU (vmatmul slot is free, f32 accumulation).
    logits = jnp.dot(w_ref[...], x_ref[...], preferred_element_type=jnp.float32)
    logits = logits + b_ref[...]  # (C_out, 1) broadcast over pixel lanes

    # Numerically stable softmax over the class/channel (sublane) axis == dim=1.
    m = jnp.max(logits, axis=0, keepdims=True)
    e = jnp.exp(logits - m)
    denom = jnp.sum(e, axis=0, keepdims=True)
    # EUP approx reciprocal + one Newton-Raphson refinement: keeps the divide on
    # the otherwise-idle EUP while normalizing columns to ~1e-6.
    r = pl.reciprocal(denom, approx=True)
    r = r * (2.0 - denom * r)
    o_ref[...] = (e * r).astype(o_ref.dtype)


def _pick_tile(P, B, tn_req):
    """Pick the lane (pixel) tile size per generation + grid-occupancy rules."""
    cap = 32768
    try:
        # v7x has only 64 MiB physical VMEM per TC -> use a smaller tile there.
        if pltpu.get_tpu_info().vmem_capacity_bytes < (100 << 20):
            cap = 16384
    except Exception:
        pass
    tn = min(int(tn_req), cap)
    if P <= tn:
        if B == 1 and P >= 512:
            # Keep >=2 grid steps so v7x's two TensorCores both get work.
            half = -(-P // 2)
            tn = -(-half // 128) * 128
        else:
            tn = P  # whole pixel row in one lane-dense tile (full-dim block)
    else:
        tn = max(128, (tn // 128) * 128)
    return tn


def passthrough_forward(x_nchw, weight, bias, *, tn=32768, out_dtype=jnp.float32):
    """x_nchw: (B, C_in, H, W) float32
       weight: (C_out, C_in) or raw PyTorch conv weight (C_out, C_in, 1, 1)
       bias:   (C_out,)
       returns (B, C_out, H, W) softmax-over-channel probabilities (out_dtype)."""
    if weight.ndim == 4:
        weight = weight.reshape(weight.shape[0], weight.shape[1])
    B, C_in, H, W = x_nchw.shape
    C_out = weight.shape[0]
    P = H * W

    tn = _pick_tile(P, B, tn)

    x_flat = x_nchw.reshape(B, C_in, P).astype(jnp.float32)   # free reshape, NCHW native
    w = weight.astype(jnp.float32)                            # (C_out, C_in)
    b_col = bias.reshape(C_out, 1).astype(jnp.float32)        # (C_out, 1)

    out = pl.pallas_call(
        _passthrough_kernel,
        out_shape=jax.ShapeDtypeStruct((B, C_out, P), out_dtype),
        grid_spec=pltpu.PrefetchScalarGridSpec(
            num_scalar_prefetch=0,
            grid=(B, pl.cdiv(P, tn)),
            in_specs=[
                pl.BlockSpec((None, C_in, tn), lambda b, i: (b, 0, i)),
                pl.BlockSpec((C_out, C_in), lambda b, i: (0, 0)),
                pl.BlockSpec((C_out, 1), lambda b, i: (0, 0)),
            ],
            out_specs=pl.BlockSpec((None, C_out, tn), lambda b, i: (b, 0, i)),
        ),
        compiler_params=pltpu.CompilerParams(
            dimension_semantics=("parallel", "parallel"),
            # ~20 MiB actual footprint at tn=32768; raise the scoped default
            # (16 MiB on v5e) while staying well inside every chip's physical VMEM.
            vmem_limit_bytes=64 << 20,
        ),
    )(x_flat, w, b_col)

    return out.reshape(B, C_out, H, W)


def _reference_forward(x_nchw, weight, bias):
    # Pure-JAX reference (1x1 conv == channel matmul) for sanity checking.
    logits = jnp.einsum("bchw,oc->bohw", x_nchw, weight) + bias[None, :, None, None]
    return jax.nn.softmax(logits, axis=1)


if __name__ == "__main__":
    key = jax.random.PRNGKey(0)
    kx, kw, kb = jax.random.split(key, 3)

    B, C_in, H, W = 2, N_CHANNELS, 16, 16
    x = jax.random.normal(kx, (B, C_in, H, W), dtype=jnp.float32)

    # Deterministic parameter init (mimics PyTorch conv default uniform bound).
    bound = 1.0 / (C_in ** 0.5)
    weight = jax.random.uniform(kw, (N_CLASSES, C_in), jnp.float32, -bound, bound)
    bias = jax.random.uniform(kb, (N_CLASSES,), jnp.float32, -bound, bound)

    out = jax.block_until_ready(passthrough_forward(x, weight, bias))
    ref = _reference_forward(x, weight, bias)
    assert out.shape == (B, N_CLASSES, H, W)
    assert jnp.allclose(out, ref, atol=2e-3, rtol=2e-3)
    assert jnp.allclose(out.sum(axis=1), 1.0, atol=1e-3)

    # "tile == full pixel row" path with a non-multiple-of-128 spatial size.
    x2 = jax.random.normal(kx, (1, C_in, 10, 10), dtype=jnp.float32)
    out2 = jax.block_until_ready(passthrough_forward(x2, weight, bias))
    ref2 = _reference_forward(x2, weight, bias)
    assert jnp.allclose(out2, ref2, atol=2e-3, rtol=2e-3)

    # Ragged multi-tile path (P=640, tn=256 -> 3 tiles, last one partial/masked).
    x3 = jax.random.normal(kx, (1, C_in, 20, 32), dtype=jnp.float32)
    out3 = jax.block_until_ready(passthrough_forward(x3, weight, bias, tn=256))
    ref3 = _reference_forward(x3, weight, bias)
    assert jnp.allclose(out3, ref3, atol=2e-3, rtol=2e-3)

    print("KERNEL_OK")
</pallas_src>

<mosaic_0001>
module attributes {stable_mosaic.version = 11 : i64} {
  func.func @_passthrough_kernel(%arg0: i32, %arg1: i32, %arg2: memref<1x3x256xf32, #tpu.memory_space<vmem>>, %arg3: memref<35x3xf32, #tpu.memory_space<vmem>>, %arg4: memref<35x1xf32, #tpu.memory_space<vmem>>, %arg5: memref<1x35x256xf32, #tpu.memory_space<vmem>>) attributes {dimension_semantics = [#tpu.dimension_semantics<parallel>, #tpu.dimension_semantics<parallel>], iteration_bounds = array<i64: 2, 1>, scalar_prefetch = 0 : i64, scratch_operands = 0 : i64, tpu.core_type = #tpu.core_type<tc>, window_params = [{transform_indices = @transform_0, window_bounds = array<i64: 1, 3, 256>}, {pipeline_mode = #tpu.pipeline_mode<synchronous>, transform_indices = @transform_1, window_bounds = array<i64: 35, 3>}, {pipeline_mode = #tpu.pipeline_mode<synchronous>, transform_indices = @transform_2, window_bounds = array<i64: 35, 1>}, {transform_indices = @transform_3, window_bounds = array<i64: 1, 35, 256>}]} {
    %c0 = arith.constant 0 : index
    %c0_0 = arith.constant 0 : index
    %0 = vector.load %arg3[%c0, %c0_0] : memref<35x3xf32, #tpu.memory_space<vmem>>, vector<35x3xf32>
    %c0_1 = arith.constant 0 : index
    %c0_2 = arith.constant 0 : index
    %c0_3 = arith.constant 0 : index
    %1 = vector.load %arg2[%c0_1, %c0_2, %c0_3] : memref<1x3x256xf32, #tpu.memory_space<vmem>>, vector<1x3x256xf32>
    %2 = vector.shape_cast %1 : vector<1x3x256xf32> to vector<3x256xf32>
    %cst = arith.constant dense<0.000000e+00> : vector<35x256xf32>
    %3 = tpu.matmul %0, %2, %cst {dimension_numbers = #tpu.dot_dimension_numbers<[1], [0], [0], [1], [0, 0, 1, 1], [], []>} : vector<35x3xf32>, vector<3x256xf32>, vector<35x256xf32> -> vector<35x256xf32>
    %c0_4 = arith.constant 0 : index
    %c0_5 = arith.constant 0 : index
    %4 = vector.load %arg4[%c0_4, %c0_5] : memref<35x1xf32, #tpu.memory_space<vmem>>, vector<35x1xf32>
    %5 = vector.broadcast %4 : vector<35x1xf32> to vector<35x256xf32>
    %6 = arith.addf %3, %5 : vector<35x256xf32>
    %cst_6 = arith.constant dense<0xFF800000> : vector<256xf32>
    %7 = vector.multi_reduction <maximumf>, %6, %cst_6 [0] : vector<35x256xf32> to vector<256xf32>
    %8 = vector.shape_cast %7 : vector<256xf32> to vector<1x256xf32>
    %9 = vector.broadcast %8 : vector<1x256xf32> to vector<35x256xf32>
    %10 = arith.subf %6, %9 : vector<35x256xf32>
    %11 = math.exp %10 : vector<35x256xf32>
    %cst_7 = arith.constant dense<0.000000e+00> : vector<256xf32>
    %12 = vector.multi_reduction <add>, %11, %cst_7 [0] : vector<35x256xf32> to vector<256xf32>
    %13 = vector.shape_cast %12 : vector<256xf32> to vector<1x256xf32>
    %14 = tpu.reciprocal %13 {approx = true} : vector<1x256xf32> -> vector<1x256xf32>
    %15 = arith.mulf %13, %14 : vector<1x256xf32>
    %cst_8 = arith.constant 2.000000e+00 : f32
    %16 = vector.broadcast %cst_8 : f32 to vector<1x256xf32>
    %17 = arith.subf %16, %15 : vector<1x256xf32>
    %18 = arith.mulf %14, %17 : vector<1x256xf32>
    %19 = vector.broadcast %18 : vector<1x256xf32> to vector<35x256xf32>
    %20 = arith.mulf %11, %19 : vector<35x256xf32>
    %c0_9 = arith.constant 0 : index
    %c0_10 = arith.constant 0 : index
    %c0_11 = arith.constant 0 : index
    %21 = vector.load %arg5[%c0_9, %c0_10, %c0_11] : memref<1x35x256xf32, #tpu.memory_space<vmem>>, vector<1x35x256xf32>
    %22 = vector.shape_cast %21 : vector<1x35x256xf32> to vector<35x256xf32>
    %23 = vector.shape_cast %20 : vector<35x256xf32> to vector<1x35x256xf32>
    tpu.vector_store %arg5[%c0_9, %c0_10, %c0_11], %23 {strides = array<i32>} : memref<1x35x256xf32, #tpu.memory_space<vmem>>, vector<1x35x256xf32>,
    return
  }
  func.func @transform_0(%arg0: i32, %arg1: i32) -> (i32, i32, i32) {
    %c0_i32 = arith.constant 0 : i32
    %c0_i32_0 = arith.constant 0 : i32
    return %arg0, %c0_i32, %arg1 : i32, i32, i32
  }
  func.func @transform_1(%arg0: i32, %arg1: i32) -> (i32, i32) {
    %c0_i32 = arith.constant 0 : i32
    %c0_i32_0 = arith.constant 0 : i32
    %c0_i32_1 = arith.constant 0 : i32
    return %c0_i32, %c0_i32_0 : i32, i32
  }
  func.func @transform_2(%arg0: i32, %arg1: i32) -> (i32, i32) {
    %c0_i32 = arith.constant 0 : i32
    %c0_i32_0 = arith.constant 0 : i32
    %c0_i32_1 = arith.constant 0 : i32
    return %c0_i32, %c0_i32_0 : i32, i32
  }
  func.func @transform_3(%arg0: i32, %arg1: i32) -> (i32, i32, i32) {
    %c0_i32 = arith.constant 0 : i32
    %c0_i32_0 = arith.constant 0 : i32
    return %arg0, %c0_i32, %arg1 : i32, i32, i32
  }
}

</mosaic_0001>

<bundles_post_ra>
// kernel: tpu_custom_call.1
= control target key start
LH: loop header
LB: loop body
LE: loop exit
PB: predicated region body
PF: predicated region fallthrough
CT: control target
= control target key end

     0   :  { %8 = vsyncpa [#allocation3], 0  ;;  %s1228_s0 = inlined_call_operand.hbm [shape: f32[2,3,256], index: 0, kind: input, shape index: {}]   ;;  %s1229_s1 = inlined_call_operand.hbm [shape: f32[35,3], index: 1, kind: input, shape index: {}]   ;;  %s1230_s2 = inlined_call_operand.hbm [shape: f32[35,1], index: 2, kind: input, shape index: {}]   ;;  %s1231_s3 = inlined_call_operand.hbm [shape: f32[2,35,256], index: 3, kind: output, shape index: {}]  }
   0x1   :  { %10 = vsyncpa [#allocation3 + $0x1], 0 }
   0x2   :  { %11 = vsyncpa [#allocation6], 0 }
   0x3   :  { %12 = vsyncpa [#allocation4], 0 }
   0x4   :  { %14 = vsyncpa [#allocation4 + $0x1], 0  ;;  %s962_s12 = smov 0   ;;  %s964_s13 = smov 0  }
   0x5   :  { %s966_s14 = smov 0   ;;  %s968_s15 = smov 0  }
   0x6   :  { %s970_s16 = smov 0   ;;  %s972_s17 = smov 0  }
   0x7 LB: > { %s614_s18 = sadd.s32 4294967295, %s930_s17   ;;  %s615_s19 = sadd.s32 4294967294, %s930_s17   ;;  %s930_s17 = sphi %s972_s17, %s20_s17   ;;  %s926_s16 = sphi %s970_s16, %s1253_s16   ;;  %s922_s15 = sphi %s968_s15, %s1252_s15   ;;  %s918_s14 = sphi %s966_s14, %s1251_s14   ;;  %s914_s13 = sphi %s964_s13, %s1250_s13   ;;  %s910_s12 = sphi %s962_s12, %s1249_s12  }
   0x8   : > { %p54_p0 = scmp.ne.s32.totalorder %s914_s13, %s910_s12  ;;  %p996_p1 = scmp.eq.s32.totalorder %s614_s18, 0 }
   0x9   : > { %p1000_p2 = scmp.eq.s32.totalorder %s614_s18, 1  ;;  %p128_p3 = scmp.eq.s32.totalorder %s615_s19, 1 }
   0xa   : > { %s1236_s20 = scalar_select %p996_p1, 1, 0 }
   0xb   : > { %p1006_p4 = por %p996_p1, %p54_p0  ;;  %p616_p5 = scmp.ge.s32.totalorder %s930_s17, 1 }
   0xc   : > { %p1011_p6 = por %p128_p3, %p54_p0  ;;  %p135_p7 = scmp.lt.s32.totalorder %s930_s17, 3 }
   0xd   : > { %s1238_s22 = scalar_select %p1006_p4, 1, 0 }
   0xe   : > { %s1239_s23 = scalar_select %p1011_p6, 1, 0 }
   0xf   : > { %p1016_p8 = pnand %p616_p5, %p135_p7  ;;  %s932_s25 = smov [#allocation5]  }
  0x10   : > { %s147_s26 = sshll.u32 %s932_s25, 4  ;;  %s933_s28 = smov [#allocation7]   ;;  %s1020_s26 = int_to_ptr.vmem [resolvable:$true] %s147_s26 }
  0x11   : > { %p654_p9 = pneg %p1016_p8  ;;  %s160_s29 = sshll.u32 %s933_s28, 4  ;;  %s1031_s29 = int_to_ptr.vmem [resolvable:$true] %s160_s29 }
  0x12   : > { %s758_s5 = scalar_lea.hbm %s1229_s1, 640 }
  0x13   : > { %p1027_p11 = pnand %p654_p9, %p996_p1  ;;  %p759_p12 = scmp.ne.s32.totalorder %s1229_s1, %s758_s5 }
  0x14   : > { %p765_p5 = scmp.lt.u32.totalorder %s758_s5, %s1229_s1 }
  0x15   : > { %p760_p13 = pneg %p1027_p11 }
  0x17   : > { %p761_p0 = pnand %p760_p13, %p759_p12 }
  0x19   : > { %p762_p3 = pneg %p761_p0 }
  0x1b   : > { %p767_p7 = pnand %p765_p5, %p762_p3 }
  0x1d   : > { %770 = shalt.err (!%p767_p7)
}
  0x1e   : > { %s771_s10 = scalar_lea.vmem %s1020_s26, 640  ;;  %p779_p1 = scmp.lt.s32.totalorder %s1020_s26, %s1020_s26 }
  0x1f   : > { %p772_p9 = scmp.ne.s32.totalorder %s1020_s26, %s771_s10  ;;  %p780_p12 = scmp.lt.s32.totalorder %s771_s10, %s771_s10 }
  0x21   : > { %p774_p10 = pnand %p772_p9, %p760_p13  ;;  %p781_p0 = por %p780_p12, %p779_p1 }
  0x23   : > { %p775_p6 = pneg %p774_p10 }
  0x25   : > { %p782_p4 = pnand %p781_p0, %p775_p6 }
  0x27   : > { %785 = shalt.err (!%p782_p4)
}
  0x28   : > { %s934_s11 = smov 128   ;;  %s935_s18 = smov 8  }
  0x29   : > { %657 = dma.hbm_to_vmem [thread:$0]  (!%p1027_p11), %s1229_s1, 640, %s1020_s26, [#allocation6], %s934_s11, %s934_s11, %s935_s18  }
  0x2a   : > { %s786_s4 = scalar_lea.hbm %s1230_s2, 640 }
  0x2b   : > { %p787_p1 = scmp.ne.s32.totalorder %s1230_s2, %s786_s4  ;;  %p793_p10 = scmp.lt.u32.totalorder %s786_s4, %s1230_s2 }
  0x2d   : > { %p789_p4 = pnand %p787_p1, %p760_p13 }
  0x2f   : > { %p790_p6 = pneg %p789_p4 }
  0x31   : > { %p795_p3 = pnand %p793_p10, %p790_p6 }
  0x33   : > { %798 = shalt.err (!%p795_p3)
}
  0x34   : > { %s799_s26 = scalar_lea.vmem %s1031_s29, 640  ;;  %p807_p12 = scmp.lt.s32.totalorder %s1031_s29, %s1031_s29 }
  0x35   : > { %p800_p5 = scmp.ne.s32.totalorder %s1031_s29, %s799_s26  ;;  %p808_p0 = scmp.lt.s32.totalorder %s799_s26, %s799_s26 }
  0x37   : > { %p802_p7 = pnand %p800_p5, %p760_p13  ;;  %p809_p1 = por %p808_p0, %p807_p12 }
  0x39   : > { %p803_p9 = pneg %p802_p7 }
  0x3b   : > { %p810_p4 = pnand %p809_p1, %p803_p9 }
  0x3d   : > { %813 = shalt.err (!%p810_p4)
}
  0x3e   : > { %660 = dma.hbm_to_vmem [thread:$0]  (!%p1027_p11), %s1230_s2, 640, %s1031_s29, [#allocation6], %s934_s11, %s934_s11, %s935_s18  }
  0x3f   : > { %s32_s19 = sadd.s32 1, %s926_s16  ;;  %s41_s25 = sadd.s32 1, %s918_s14 }
  0x40   : > { %p34_p13 = scmp.ge.s32.totalorder %s32_s19, 2  ;;  %p48_p6 = scmp.ne.s32.totalorder %s918_s14, %s914_s13 }
  0x41   : > { %p49_p10 = scmp.eq.s32.totalorder %s930_s17, 0  ;;  %p671_p3 = scmp.lt.s32.totalorder %s930_s17, 2 }
  0x42   : > { %s1255_s19 = smov (%p34_p13, %s32_s19), 0  ;;  %p1095_p7 = por %p1000_p2, %p48_p6 }
  0x43   : > { %p50_p5 = por %p49_p10, %p48_p6  ;;  %s36_s28 = ssub.s32 %s926_s16, %s1255_s19 }
  0x44   : > { %s1242_s27 = scalar_select %p1095_p7, 1, 0 }
  0x45   : > { %s174_s30 = sand.u32 1, %s918_s14   ;;  %p39_p9 = scmp.eq.s32.totalorder %s36_s28, 0 }
  0x46   : > { %s620_s29 = sshll.u32 %s174_s30, 3  ;;  %s637_s11 = sshll.u32 %s926_s16, 7 }
  0x47   : > { %s1104_s18 = scalar_select %p39_p9, %s918_s14, %s41_s25  }
  0x48   : > { %s1109_s6 = scalar_lea.hbm %s1228_s0, %s637_s11  ;;  %s178_s21 = scalar_lea.vmem [#allocation2], %s620_s29 }
  0x49   : > { %s188_s7 = sshll.u32 %s178_s21, 4  ;;  %p1113_p2 = pnand %p671_p3, %p50_p5  ;;  %s1117_s7 = int_to_ptr.vmem [resolvable:$true] %s188_s7 }
  0x4a   : > { %s175_s26 = scalar_lea.sflag [#allocation3], %s174_s30  ;;  %s814_s9 = scalar_lea.hbm %s1109_s6, 128 }
  0x4b   : > { %p815_p11 = scmp.ne.s32.totalorder %s1109_s6, %s814_s9  ;;  %p816_p12 = pneg %p1113_p2 }
  0x4c   : > { %s819_s28 = scalar_lea.hbm %s1228_s0, 256  ;;  %p820_p4 = scmp.lt.u32.totalorder %s1109_s6, %s1228_s0 }
  0x4d   : > { %p817_p0 = pnand %p816_p12, %p815_p11  ;;  %p821_p13 = scmp.lt.u32.totalorder %s819_s28, %s814_s9 }
  0x4e   : > { %p823_p10 = scmp.lt.u32.totalorder %s814_s9, %s1109_s6 }
  0x4f   : > { %p818_p1 = pneg %p817_p0  ;;  %p822_p6 = por %p821_p13, %p820_p4 }
  0x51   : > { %p824_p3 = por %p823_p10, %p822_p6 }
  0x53   : > { %p825_p5 = pnand %p824_p3, %p818_p1 }
  0x55   : > { %828 = shalt.err (!%p825_p5)
}
  0x56   : > { %s829_s30 = scalar_lea.vmem %s1117_s7, 128  ;;  %s936_s4 = smov [#allocation2]  }
  0x57   : > { %p830_p9 = scmp.ne.s32.totalorder %s1117_s7, %s829_s30  ;;  %s834_s5 = sshll.u32 %s936_s4, 4  ;;  %s835_s5 = int_to_ptr.vmem [resolvable:$false] %s834_s5 }
  0x58   : > { %s836_s21 = scalar_lea.vmem %s835_s5, 256  ;;  %p837_p7 = scmp.lt.s32.totalorder %s1117_s7, %s835_s5 }
  0x59   : > { %p832_p11 = pnand %p830_p9, %p816_p12  ;;  %p838_p4 = scmp.lt.s32.totalorder %s836_s21, %s829_s30 }
  0x5b   : > { %p833_p0 = pneg %p832_p11  ;;  %p839_p13 = por %p838_p4, %p837_p7 }
  0x5d   : > { %p840_p6 = pnand %p839_p13, %p833_p0 }
  0x5f   : > { %843 = shalt.err (!%p840_p6)
}
  0x60   : > { %664 = dma.hbm_to_vmem [thread:$0]  (!%p1113_p2), %s1109_s6, 128, %s1117_s7, %s175_s26  }
  0x61   : > { %197 = sbr.rel (%p1016_p8) target bundleno = 430 (0x1ae), region = 32  ;;  %s1147_s9 = sand.u32 (!%p1016_p8), 1, %s914_s13  }
  0x62   : > { %s624_s10 = sshll.u32 (!%p1016_p8), %s1147_s9, 3  ;;  %s200_s25 = scalar_lea.sflag (!%p1016_p8), [#allocation3], %s1147_s9 }
  0x63   : > { %s203_s28 = scalar_lea.vmem (!%p1016_p8), [#allocation2], %s624_s10  ;;  %p1244_p7 = scmp.ne.s32.totalorder (!%p1016_p8), %s1238_s22, 0 }
  0x68   : > { %897 = dma.done.wait (%p1244_p7), %s200_s25, 128  }
  0x69   : > { %899 = vsyncadd (%p1244_p7), %s200_s25, 4294967168  ;;  %p1245_p12 = scmp.ne.s32.totalorder %s1236_s20, 0 }
  0x6b   : > { %901 = dma.done.wait (%p1245_p12), [#allocation6], 1280  }
  0x6c   : > { %903 = vsyncadd (%p1245_p12), [#allocation6], 4294966016  ;;  %v937_v0 = vmov 0.0   ;;  %v938_v1 = vmov 0   ;;  %v241_v2 = vld [vmem:[%s203_s28] sm:$0x77] }
  0x6d   : > { %359 = vmatprep.mubr.f32.mxu0 %v937_v0  ;;  %377 = vmatprep.mubr.f32.mxu1 %v937_v0  ;;  %vm290_vm0 = vcmask 1042432   ;;  %v273_v3 = vcombine.high %v241_v2, %v241_v2  ;;  %v236_v4 = vld [vmem:[#allocation5] sm:$0xff]  ;;  %vm274_vm1 = vcmask 23552   ;;  %v239_v5 = vld [vmem:[#allocation5 + $0x18] sm:$0xff]  ;;  %v242_v6 = vld [vmem:[#allocation7] sm:$0xff]  ;;  %s640_s20 = smul.u32 80, %s1147_s9 }
  0x6e   : > { %731 = vset.pattern.permute.xlu0 %v938_v1  ;;  %732 = vset.pattern.permute.xlu1 %v938_v1  ;;  %v246_v7 = vld [vmem:[#allocation7 + $0x20] sm:$0x7]  ;;  %v240_v9 = vld [vmem:[#allocation5 + $0x20] sm:$0x7]  ;;  %v244_v10 = vld [vmem:[#allocation7 + $0x10] sm:$0xff]  ;;  %s641_s22 = smul.u32 1280, %s922_s15 }
  0x6f   : > { %627 = vmatprep.subr.msk.mxu0 %vm290_vm0, %v273_v3  ;;  %638 = vmatprep.subr.msk.mxu1 %vm290_vm0, %v273_v3  ;;  %v237_v8 = vld [vmem:[#allocation5 + $0x8] sm:$0xff]  ;;  %v243_v11 = vld [vmem:[#allocation7 + $0x8] sm:$0xff]  ;;  %v245_v13 = vld [vmem:[#allocation7 + $0x18] sm:$0xff]  ;;  %s233_s24 = scalar_lea.vmem [#allocation8], %s640_s20  ;;  %s493_s15 = scalar_lea.sflag [#allocation4], %s1147_s9 }
  0x70   : > { %628 = vmatpush1.msk.msra.mxu0 %vm290_vm0, %v241_v2  ;;  %639 = vmatpush1.msk.msra.mxu1 %vm290_vm0, %v241_v2  ;;  %v238_v12 = vld [vmem:[#allocation5 + $0x10] sm:$0xff]  ;;  %s508_s6 = sshll.u32 %s233_s24, 4  ;;  %s1177_s26 = scalar_lea.hbm %s1231_s3, %s641_s22  ;;  %s1179_s6 = int_to_ptr.vmem [resolvable:$true] %s508_s6 }
  0x71   : > { %629 = vmatmul.mubr.msk.f32.vlgmr.msra.gmra.mrb[0].mxu0 %vm274_vm1, %v236_v4  ;;  %632 = vmatmul.mubr.msk.f32.vlgmr.msra.gmra.mrb[0].mxu1 %vm274_vm1, %v239_v5  ;;  %s844_s29 = scalar_lea.vmem %s1179_s6, 1280  ;;  %p1246_p2 = scmp.ne.s32.totalorder %s1242_s27, 0 }
  0x72   : > { %365 = vmatprep.mubr.f32.mxu0 %v937_v0  ;;  %383 = vmatprep.mubr.f32.mxu1 %v937_v0  ;;  %p845_p8 = scmp.ne.s32.totalorder %s1179_s6, %s844_s29  ;;  %s939_s11 = smov [#allocation8]  }
  0x73   : > { %249 = vperm.xlu0 %731, %v242_v6   ;;  %269 = vperm.xlu1 %732, %v246_v7   ;;  %s848_s30 = sshll.u32 %s939_s11, 4  ;;  %s849_s30 = int_to_ptr.vmem [resolvable:$false] %s848_s30 }
  0x74   : > { %p846_p1 = pnand %p845_p8, %p1246_p2  ;;  %s850_s4 = scalar_lea.vmem %s849_s30, 2560 }
  0x75   : > { %630 = vmatmul.mubr.msk.f32.gmra.mrb[2].mxu0 %vm274_vm1, %v237_v8  ;;  %633 = vmatmul.mubr.msk.f32.gmra.mrb[2].mxu1 %vm274_vm1, %v240_v9  ;;  %p851_p3 = scmp.lt.s32.totalorder %s1179_s6, %s849_s30  ;;  %p852_p5 = scmp.lt.s32.totalorder %s850_s4, %s844_s29 }
  0x76   : > { %371 = vmatprep.mubr.f32.mxu0 %v937_v0  ;;  %p847_p10 = pneg %p846_p1 }
  0x77   : > { %259 = vperm.xlu0 %731, %v244_v10   ;;  %254 = vperm.xlu1 %732, %v243_v11   ;;  %p853_p9 = por %p852_p5, %p851_p3 }
  0x79   : > { %631 = vmatmul.mubr.msk.f32.gmra.mrb[4].mxu0 %vm274_vm1, %v238_v12  ;;  %p854_p11 = pnand %p853_p9, %p847_p10 }
  0x7b   : > { %264 = vperm.xlu0 %731, %v245_v13  }
  0xf2   : > { %v250_v14 = vpop.permute.xlu0 %249  ;;  %v270_v16 = vpop.permute.xlu1 %269 }
  0xf6   : > { %v260_v15 = vpop.permute.xlu0 %259  ;;  %v255_v22 = vpop.permute.xlu1 %254 }
  0xfa   : > { %v265_v17 = vpop.permute.xlu0 %264 }
 0x144   : > { %v361_v18 = vpop.f32.mrb[0].mxu0  ;;  %v379_v19 = vpop.f32.mrb[0].mxu1 }
 0x145   : > { %v363_v20 = vpop.f32.mrb[1].mxu0  ;;  %v381_v21 = vpop.f32.mrb[1].mxu1  ;;  %v380_v23 = vadd.f32 %v379_v19, %v265_v17  ;;  %v362_v35 = vadd.f32 %v361_v18, %v250_v14 }
 0x146   : > { %v382_v29 = vadd.f32 %v381_v21, %v265_v17  ;;  %v364_v39 = vadd.f32 %v363_v20, %v250_v14 }
 0x148   : > { %v367_v24 = vpop.f32.mrb[2].mxu0  ;;  %v385_v25 = vpop.f32.mrb[2].mxu1 }
 0x149   : > { %v368_v26 = vadd.f32 %v367_v24, %v255_v22  ;;  %v369_v27 = vpop.f32.mrb[3].mxu0  ;;  %v387_v28 = vpop.f32.mrb[3].mxu1  ;;  %v386_v33 = vadd.f32 %v385_v25, %v270_v16 }
 0x14a   : > { %v370_v30 = vadd.f32 %v369_v27, %v255_v22  ;;  %v388_v36 = vadd.f32 %v387_v28, %v270_v16 }
 0x14b   : > { %v391_v31 = vmax.f32 %v368_v26, %v380_v23  ;;  %v392_v42 = vsel %vm290_vm0, %v386_v33, -inf }
 0x14c   : > { %v402_v32 = vmax.f32 %v370_v30, %v382_v29  ;;  %v373_v34 = vpop.f32.mrb[4].mxu0  ;;  %v403_v44 = vsel %vm290_vm0, %v388_v36, -inf }
 0x14d   : > { %v374_v37 = vadd.f32 %v373_v34, %v260_v15  ;;  %v375_v38 = vpop.f32.mrb[5].mxu0 }
 0x14e   : > { %v376_v40 = vadd.f32 %v375_v38, %v260_v15 }
 0x14f   : > { %v390_v41 = vmax.f32 %v362_v35, %v374_v37 }
 0x150   : > { %v401_v43 = vmax.f32 %v364_v39, %v376_v40 }
 0x151   : > { %v393_v45 = vmax.f32 %v390_v41, %v392_v42 }
 0x152   : > { %v404_v46 = vmax.f32 %v401_v43, %v403_v44 }
 0x153   : > { %v394_v47 = vmax.f32 %v393_v45, %v391_v31 }
 0x154   : > { %v405_v48 = vmax.f32 %v404_v46, %v402_v32 }
 0x155   : > { %v395_v49 = vrot.slane %v394_v47, 4 }
 0x156   : > { %v406_v50 = vrot.slane %v405_v48, 4 }
 0x157   : > { %v396_v51 = vmax.f32 %v394_v47, %v395_v49 }
 0x158   : > { %v407_v52 = vmax.f32 %v405_v48, %v406_v50 }
 0x159   : > { %v397_v53 = vrot.slane %v396_v51, 2 }
 0x15a   : > { %v408_v54 = vrot.slane %v407_v52, 2 }
 0x15b   : > { %v398_v55 = vmax.f32 %v396_v51, %v397_v53 }
 0x15c   : > { %v409_v56 = vmax.f32 %v407_v52, %v408_v54 }
 0x15d   : > { %v399_v57 = vrot.slane %v398_v55, 1 }
 0x15e   : > { %v410_v58 = vrot.slane %v409_v56, 1 }
 0x15f   : > { %v400_v59 = vmax.f32 %v398_v55, %v399_v57 }
 0x160   : > { %v411_v60 = vmax.f32 %v409_v56, %v410_v58 }
 0x161   : > { %v412_v61 = vsub.f32 %v362_v35, %v400_v59  ;;  %v414_v62 = vsub.f32 %v368_v26, %v400_v59  ;;  %v416_v63 = vsub.f32 %v374_v37, %v400_v59  ;;  %v418_v0 = vsub.f32 %v380_v23, %v400_v59 }
 0x162   : > { %v420_v1 = vsub.f32 %v386_v33, %v400_v59  ;;  %v413_v2 = vsub.f32 %v364_v39, %v411_v60  ;;  %v415_v3 = vsub.f32 %v370_v30, %v411_v60  ;;  %v417_v4 = vsub.f32 %v376_v40, %v411_v60 }
 0x163   : > { %v422_v5 = vmul.f32 1.442695, %v412_v61  ;;  %v426_v6 = vmul.f32 1.442695, %v414_v62  ;;  %v430_v7 = vmul.f32 1.442695, %v416_v63  ;;  %v419_v8 = vsub.f32 %v382_v29, %v411_v60 }
 0x164   : > { %v434_v9 = vmul.f32 1.442695, %v418_v0  ;;  %v421_v10 = vsub.f32 %v388_v36, %v411_v60  ;;  %v438_v11 = vmul.f32 1.442695, %v420_v1  ;;  %v424_v12 = vmul.f32 1.442695, %v413_v2 }
 0x165   : > { %734 = vpow2.f32 %v422_v5  ;;  %v428_v13 = vmul.f32 1.442695, %v415_v3  ;;  %v432_v14 = vmul.f32 1.442695, %v417_v4  ;;  %v436_v16 = vmul.f32 1.442695, %v419_v8 }
 0x166   : > { %736 = vpow2.f32 %v426_v6  ;;  %v440_v15 = vmul.f32 1.442695, %v421_v10 }
 0x167   : > { %738 = vpow2.f32 %v430_v7 }
 0x168   : > { %740 = vpow2.f32 %v434_v9 }
 0x169   : > { %742 = vpow2.f32 %v438_v11 }
 0x16a   : > { %744 = vpow2.f32 %v424_v12 }
 0x16b   : > { %746 = vpow2.f32 %v428_v13 }
 0x16c   : > { %748 = vpow2.f32 %v432_v14 }
 0x16d   : > { %750 = vpow2.f32 %v440_v15 }
 0x16e   : > { %752 = vpow2.f32 %v436_v16 }
 0x16f   : > { %v735_v17 = vpop.eup %734 }
 0x170   : > { %v737_v18 = vpop.eup %736 }
 0x171   : > { %v739_v19 = vpop.eup %738  ;;  %v442_v20 = vadd.f32 %v737_v18, %v735_v17 }
 0x172   : > { %v741_v21 = vpop.eup %740 }
 0x173   : > { %v743_v22 = vpop.eup %742  ;;  %v443_v23 = vadd.f32 %v739_v19, %v442_v20 }
 0x174   : > { %v745_v24 = vpop.eup %744  ;;  %v445_v27 = vsel %vm290_vm0, %v743_v22, 0.0 }
 0x175   : > { %v747_v25 = vpop.eup %746  ;;  %v444_v26 = vadd.f32 %v741_v21, %v443_v23 }
 0x176   : > { %v453_v28 = vadd.f32 %v747_v25, %v745_v24  ;;  %v749_v29 = vpop.eup %748 }
 0x177   : > { %v446_v30 = vadd.f32 %v445_v27, %v444_v26  ;;  %v751_v31 = vpop.eup %750 }
 0x178   : > { %v454_v32 = vadd.f32 %v749_v29, %v453_v28  ;;  %v753_v33 = vpop.eup %752  ;;  %v456_v37 = vsel %vm290_vm0, %v751_v31, 0.0 }
 0x179   : > { %v447_v34 = vrot.slane %v446_v30, 4 }
 0x17a   : > { %v455_v35 = vadd.f32 %v753_v33, %v454_v32 }
 0x17b   : > { %v448_v36 = vadd.f32 %v447_v34, %v446_v30 }
 0x17c   : > { %v457_v38 = vadd.f32 %v456_v37, %v455_v35 }
 0x17d   : > { %v449_v39 = vrot.slane %v448_v36, 2 }
 0x17e   : > { %v458_v40 = vrot.slane %v457_v38, 4 }
 0x17f   : > { %v450_v41 = vadd.f32 %v449_v39, %v448_v36 }
 0x180   : > { %v459_v42 = vadd.f32 %v458_v40, %v457_v38 }
 0x181   : > { %v451_v43 = vrot.slane %v450_v41, 1 }
 0x182   : > { %v460_v44 = vrot.slane %v459_v42, 2 }
 0x183   : > { %v452_v45 = vadd.f32 %v451_v43, %v450_v41 }
 0x184   : > { %v461_v46 = vadd.f32 %v460_v44, %v459_v42 }
 0x185   : > { %754 = vrcp.f32 %v452_v45 }
 0x186   : > { %v462_v47 = vrot.slane %v461_v46, 1 }
 0x188   : > { %v463_v48 = vadd.f32 %v462_v47, %v461_v46 }
 0x18a   : > { %756 = vrcp.f32 %v463_v48 }
 0x18f   : > { %v755_v49 = vpop.eup %754 }
 0x190   : > { %v466_v50 = vmul.f32 %v755_v49, %v452_v45 }
 0x192   : > { %v468_v51 = vsub.f32 2.0, %v466_v50 }
 0x194   : > { %v757_v52 = vpop.eup %756  ;;  %v470_v53 = vmul.f32 %v755_v49, %v468_v51 }
 0x195   : > { %v467_v54 = vmul.f32 %v757_v52, %v463_v48 }
 0x196   : > { %v472_v55 = vmul.f32 %v735_v17, %v470_v53  ;;  %v474_v56 = vmul.f32 %v737_v18, %v470_v53  ;;  %v476_v57 = vmul.f32 %v739_v19, %v470_v53  ;;  %v478_v58 = vmul.f32 %v741_v21, %v470_v53 }
 0x197   : > { %v480_v59 = vmul.f32 %v743_v22, %v470_v53  ;;  %v469_v60 = vsub.f32 2.0, %v467_v54 }
 0x198   : > { %482 = vst [vmem:[%s233_s24] sm:$0xff] %v472_v55  ;;  %484 = vst [vmem:[%s233_s24 + $0x10] sm:$0xff] %v474_v56 }
 0x199   : > { %486 = vst [vmem:[%s233_s24 + $0x20] sm:$0xff] %v476_v57  ;;  %488 = vst [vmem:[%s233_s24 + $0x30] sm:$0xff] %v478_v58  ;;  %v471_v61 = vmul.f32 %v757_v52, %v469_v60 }
 0x19a   : > { %490 = vst [vmem:[%s233_s24 + $0x40] sm:$0x7] %v480_v59 }
 0x19b   : > { %v473_v62 = vmul.f32 %v745_v24, %v471_v61  ;;  %v475_v63 = vmul.f32 %v747_v25, %v471_v61  ;;  %v477_v0 = vmul.f32 %v749_v29, %v471_v61  ;;  %v479_v1 = vmul.f32 %v753_v33, %v471_v61 }
 0x19c   : > { %v481_v2 = vmul.f32 %v751_v31, %v471_v61 }
 0x19d   : > { %483 = vst [vmem:[%s233_s24 + $0x8] sm:$0xff] %v473_v62  ;;  %485 = vst [vmem:[%s233_s24 + $0x18] sm:$0xff] %v475_v63 }
 0x19e   : > { %487 = vst [vmem:[%s233_s24 + $0x28] sm:$0xff] %v477_v0  ;;  %489 = vst [vmem:[%s233_s24 + $0x38] sm:$0xff] %v479_v1 }
 0x19f   : > { %491 = vst [vmem:[%s233_s24 + $0x48] sm:$0x7] %v481_v2 }
 0x1a0   : > { %857 = shalt.err (!%p854_p11)
}
 0x1a1   : > { %s858_s5 = scalar_lea.hbm %s1177_s26, 1280  ;;  %s862_s25 = scalar_lea.hbm %s1231_s3, 2560 }
 0x1a2   : > { %p859_p0 = scmp.ne.s32.totalorder %s1177_s26, %s858_s5  ;;  %p863_p6 = scmp.lt.u32.totalorder %s1177_s26, %s1231_s3 }
 0x1a3   : > { %p864_p7 = scmp.lt.u32.totalorder %s862_s25, %s858_s5  ;;  %p866_p8 = scmp.lt.u32.totalorder %s858_s5, %s1177_s26 }
 0x1a4   : > { %p860_p4 = pnand %p859_p0, %p1246_p2 }
 0x1a5   : > { %p865_p12 = por %p864_p7, %p863_p6 }
 0x1a6   : > { %p861_p13 = pneg %p860_p4 }
 0x1a7   : > { %p867_p1 = por %p866_p8, %p865_p12 }
 0x1a9   : > { %p868_p10 = pnand %p867_p1, %p861_p13 }
 0x1ab   : > { %871 = shalt.err (!%p868_p10)
}
 0x1ac   : > { %s940_s22 = smov 256   ;;  %s941_s24 = smov 16  }
 0x1ad   : > { %652 = dma.vmem_to_hbm [thread:$0]  (%p1246_p2), %s1179_s6, 1280, %s1177_s26, %s493_s15, %s940_s22, %s940_s22, %s941_s24  }
 0x1ae PF: > { %s523_s7 = sand.u32 1, %s910_s12   ;;  %p1247_p3 = scmp.ne.s32.totalorder %s1239_s23, 0 }
 0x1af   : > { %p1248_p5 = scmp.ge.s32.totalorder %s930_s17, 2  ;;  %s524_s8 = scalar_lea.sflag [#allocation4], %s523_s7 }
 0x1b1   : > { %p666_p9 = pnand %p1248_p5, %p1247_p3 }
 0x1b3   : > { %905 = dma.done.wait (!%p666_p9), %s524_s8, 1280  }
 0x1b4   : > { %907 = vsyncadd (!%p666_p9), %s524_s8, 4294966016  ;;  %s20_s17 = sadd.s32 1, %s930_s17   ;;  %s1249_s12 = smov %s914_s13 }
 0x1b5   : > { %p17_p11 = scmp.ge.s32.totalorder %s20_s17, 4   ;;  %s1250_s13 = smov %s918_s14 }
 0x1b6   : > { %s1251_s14 = smov %s1104_s18  ;;  %s1252_s15 = smov %s926_s16 }
 0x1b7   : > { %s1253_s16 = smov %s1255_s19  ;;  %19 = sbr.rel (!%p17_p11) target bundleno = 7 (0x7), region = 85 }
 0x1be   :  { %529 = vsyncpa [#allocation3], 1 }
 0x1bf   :  { %531 = vsyncpa [#allocation3 + $0x1], 1 }
 0x1c0   :  { %532 = vsyncpa [#allocation6], 1 }
 0x1c1   :  { %533 = vsyncpa [#allocation4], 1 }
 0x1c2   :  { %535 = vsyncpa [#allocation4 + $0x1], 1 }

</bundles_post_ra>
